<compile_context>
chip_gen: v7x
topology: tpu7x:2x2x1
jax: 0.10.0
libtpu: 0.0.40
codegen_flags: <defaults>
</compile_context>

<pallas_src>
import jax
import jax.numpy as jnp
from jax.experimental import pallas as pl
from jax.experimental.pallas import tpu as pltpu

_LANES = 128
_SUBLANES = 8
_MAX_TILE_ROWS = 2048   # (2048,128) f32 = 1 MiB/block; 2 arrays x 2 bufs = 4 MiB VMEM
_NUM_PARAMS = 16        # 9 used, padded to 16 for a friendly SMEM size


def _band_stop_kernel(params_ref, x_ref, o_ref):
    # params_ref: SMEM f32[16] (scalar-prefetched once before the grid runs)
    #   [0] scale = 1/(max+1e-8)   [1] norm_low_cut   [2] norm_high_cut
    #   [3] low_g                  [4] high_g         [5] stop_d
    #   [6] 1 - stop_d             [7] gauss_a = sqrt(sharpness)/stop_width
    #   [8] gauss_b = stop_center * gauss_a
    # x_ref / o_ref: VMEM f32[tile_r, 128]
    scale = params_ref[0]
    norm_low_cut = params_ref[1]
    norm_high_cut = params_ref[2]
    low_g = params_ref[3]
    high_g = params_ref[4]
    stop_d = params_ref[5]
    one_minus_stop_d = params_ref[6]
    gauss_a = params_ref[7]
    gauss_b = params_ref[8]

    norm = x_ref[...] * scale

    # Band-stop notch with sharpness/width/center folded into (gauss_a, gauss_b):
    #   stop_resp = stop_d + (1-stop_d) * exp(-(norm*a - b)^2)
    t = norm * gauss_a - gauss_b
    stop_resp = stop_d + one_minus_stop_d * jnp.exp(-(t * t))

    # Nested select: low pass-band / high pass-band / stop band.
    resp = jnp.where(norm < norm_low_cut, low_g,
                     jnp.where(norm > norm_high_cut, high_g, stop_resp))

    o_ref[...] = jnp.clip(resp, 1e-6, 1.0)


@jax.jit
def band_stop_spectral_filter(eigenvalues, low_cutoff, high_cutoff,
                              low_gain, high_gain, stop_depth,
                              transition_sharpness):
    """eigenvalues: f32[N]. Returns f32[N]."""
    eig = eigenvalues.astype(jnp.float32)
    n = eig.shape[0]

    # --- scalar glue in plain JAX (hoisted out of the kernel) ---
    low_cut = jax.nn.sigmoid(low_cutoff) * 0.8
    high_cut = low_cut + jax.nn.sigmoid(high_cutoff) * (2.0 - low_cut)
    low_g = jax.nn.sigmoid(low_gain)
    high_g = jax.nn.sigmoid(high_gain)
    stop_d = jax.nn.sigmoid(stop_depth) * 0.2
    sharpness = jnp.abs(transition_sharpness) + 1.0

    max_eig = jnp.max(eig) + 1e-8            # hoisted global reduction
    scale = 1.0 / max_eig                    # no per-element divide in kernel
    norm_low_cut = low_cut / 2.0
    norm_high_cut = high_cut / 2.0
    stop_center = (norm_low_cut + norm_high_cut) / 2.0
    stop_width = (norm_high_cut - norm_low_cut) / 2.0
    # Fold sharpness / width / center into two Gaussian coefficients.
    gauss_a = jnp.sqrt(sharpness) / stop_width
    gauss_b = stop_center * gauss_a

    params = jnp.stack([scale, norm_low_cut, norm_high_cut, low_g, high_g,
                        stop_d, 1.0 - stop_d, gauss_a,
                        gauss_b]).astype(jnp.float32)
    params = jnp.pad(params, (0, _NUM_PARAMS - params.shape[0]))

    # --- sublane-dense layout: pad only to one vreg row-group (8 x 128) ---
    rows = -(-n // _LANES)
    rows_padded = -(-rows // _SUBLANES) * _SUBLANES
    padded_n = rows_padded * _LANES
    eig_in = eig if padded_n == n else jnp.pad(eig, (0, padded_n - n))
    x2d = eig_in.reshape(rows_padded, _LANES)

    tile_r = min(rows_padded, _MAX_TILE_ROWS)
    grid = (-(-rows_padded // tile_r),)      # partial last block is masked by Pallas

    out2d = pl.pallas_call(
        _band_stop_kernel,
        out_shape=jax.ShapeDtypeStruct((rows_padded, _LANES), jnp.float32),
        grid_spec=pltpu.PrefetchScalarGridSpec(
            num_scalar_prefetch=1,           # params -> SMEM once, before the grid
            grid=grid,
            in_specs=[pl.BlockSpec((tile_r, _LANES), lambda i, p: (i, 0))],
            out_specs=pl.BlockSpec((tile_r, _LANES), lambda i, p: (i, 0)),
        ),
        compiler_params=pltpu.CompilerParams(
            dimension_semantics=("parallel",)),
    )(params, x2d)

    out_flat = out2d.reshape(padded_n)
    return out_flat if padded_n == n else out_flat[:n]


def _reference(eigenvalues, low_cutoff, high_cutoff, low_gain, high_gain,
               stop_depth, transition_sharpness):
    low_cut = jax.nn.sigmoid(low_cutoff) * 0.8
    high_cut = low_cut + jax.nn.sigmoid(high_cutoff) * (2.0 - low_cut)
    low_g = jax.nn.sigmoid(low_gain)
    high_g = jax.nn.sigmoid(high_gain)
    stop_d = jax.nn.sigmoid(stop_depth) * 0.2
    sharpness = jnp.abs(transition_sharpness) + 1.0
    max_eig = jnp.max(eigenvalues) + 1e-8
    norm = eigenvalues / max_eig
    nl = low_cut / 2.0
    nh = high_cut / 2.0
    resp = jnp.ones_like(norm)
    resp = jnp.where(norm < nl, low_g * resp, resp)
    resp = jnp.where(norm > nh, high_g * resp, resp)
    center = (nl + nh) / 2.0
    width = (nh - nl) / 2.0
    stop_resp = stop_d + (1 - stop_d) * jnp.exp(
        -sharpness * ((norm - center) / width) ** 2)
    mask = (norm >= nl) & (norm <= nh)
    resp = jnp.where(mask, stop_resp, resp)
    return jnp.clip(resp, 1e-6, 1.0)


if __name__ == "__main__":
    key = jax.random.PRNGKey(0)

    # Parameters at their nn.Module __init__ values.
    low_cutoff = jnp.float32(0.2)
    high_cutoff = jnp.float32(1.0)
    low_gain = jnp.float32(1.0)
    high_gain = jnp.float32(0.8)
    stop_depth = jnp.float32(0.05)
    transition_sharpness = jnp.float32(5.0)

    # Small eigenvalue spectrum (non-multiple of 128 to exercise the ragged tail).
    n = 200
    eigenvalues = jax.random.uniform(key, (n,), jnp.float32) * 2.0

    out = band_stop_spectral_filter(eigenvalues, low_cutoff, high_cutoff,
                                    low_gain, high_gain, stop_depth,
                                    transition_sharpness)
    out = jax.block_until_ready(out)

    ref = _reference(eigenvalues, low_cutoff, high_cutoff, low_gain,
                     high_gain, stop_depth, transition_sharpness)
    assert out.shape == eigenvalues.shape
    assert bool(jnp.allclose(out, ref, atol=1e-5, rtol=1e-5))

    print("KERNEL_OK")
</pallas_src>

<mosaic_0001>
module attributes {stable_mosaic.version = 11 : i64} {
  func.func @_band_stop_kernel(%arg0: i32, %arg1: memref<16xf32, #tpu.memory_space<smem>>, %arg2: memref<8x128xf32, #tpu.memory_space<vmem>>, %arg3: memref<8x128xf32, #tpu.memory_space<vmem>>) attributes {dimension_semantics = [#tpu.dimension_semantics<parallel>], iteration_bounds = array<i64: 1>, scalar_prefetch = 1 : i64, scratch_operands = 0 : i64, tpu.core_type = #tpu.core_type<tc>, window_params = [{transform_indices = @transform_0, window_bounds = array<i64: 8, 128>}, {transform_indices = @transform_1, window_bounds = array<i64: 8, 128>}]} {
    %c0 = arith.constant 0 : index
    %0 = memref.load %arg1[%c0] : memref<16xf32, #tpu.memory_space<smem>>
    %c1 = arith.constant 1 : index
    %1 = memref.load %arg1[%c1] : memref<16xf32, #tpu.memory_space<smem>>
    %c2 = arith.constant 2 : index
    %2 = memref.load %arg1[%c2] : memref<16xf32, #tpu.memory_space<smem>>
    %c3 = arith.constant 3 : index
    %3 = memref.load %arg1[%c3] : memref<16xf32, #tpu.memory_space<smem>>
    %c4 = arith.constant 4 : index
    %4 = memref.load %arg1[%c4] : memref<16xf32, #tpu.memory_space<smem>>
    %c5 = arith.constant 5 : index
    %5 = memref.load %arg1[%c5] : memref<16xf32, #tpu.memory_space<smem>>
    %c6 = arith.constant 6 : index
    %6 = memref.load %arg1[%c6] : memref<16xf32, #tpu.memory_space<smem>>
    %c7 = arith.constant 7 : index
    %7 = memref.load %arg1[%c7] : memref<16xf32, #tpu.memory_space<smem>>
    %c8 = arith.constant 8 : index
    %8 = memref.load %arg1[%c8] : memref<16xf32, #tpu.memory_space<smem>>
    %c0_0 = arith.constant 0 : index
    %c0_1 = arith.constant 0 : index
    %9 = vector.load %arg2[%c0_0, %c0_1] : memref<8x128xf32, #tpu.memory_space<vmem>>, vector<8x128xf32>
    %10 = vector.broadcast %0 : f32 to vector<8x128xf32>
    %11 = arith.mulf %9, %10 : vector<8x128xf32>
    %12 = vector.broadcast %7 : f32 to vector<8x128xf32>
    %13 = arith.mulf %11, %12 : vector<8x128xf32>
    %14 = vector.broadcast %8 : f32 to vector<8x128xf32>
    %15 = arith.subf %13, %14 : vector<8x128xf32>
    %16 = arith.mulf %15, %15 : vector<8x128xf32>
    %cst = arith.constant 0.000000e+00 : f32
    %17 = vector.broadcast %cst : f32 to vector<8x128xf32>
    %18 = arith.subf %17, %16 : vector<8x128xf32>
    %19 = math.exp %18 : vector<8x128xf32>
    %20 = vector.broadcast %6 : f32 to vector<8x128xf32>
    %21 = arith.mulf %20, %19 : vector<8x128xf32>
    %22 = vector.broadcast %5 : f32 to vector<8x128xf32>
    %23 = arith.addf %22, %21 : vector<8x128xf32>
    %24 = vector.broadcast %1 : f32 to vector<8x128xf32>
    %25 = arith.cmpf olt, %11, %24 : vector<8x128xf32>
    %26 = vector.broadcast %2 : f32 to vector<8x128xf32>
    %27 = arith.cmpf ogt, %11, %26 : vector<8x128xf32>
    %28 = vector.broadcast %4 : f32 to vector<8x128xf32>
    %29 = arith.select %27, %28, %23 : vector<8x128xi1>, vector<8x128xf32>
    %30 = vector.broadcast %3 : f32 to vector<8x128xf32>
    %31 = arith.select %25, %30, %29 : vector<8x128xi1>, vector<8x128xf32>
    %cst_2 = arith.constant 9.99999997E-7 : f32
    %cst_3 = arith.constant 1.000000e+00 : f32
    %32 = vector.broadcast %cst_2 : f32 to vector<8x128xf32>
    %33 = arith.maximumf %32, %31 : vector<8x128xf32>
    %34 = vector.broadcast %cst_3 : f32 to vector<8x128xf32>
    %35 = arith.minimumf %34, %33 : vector<8x128xf32>
    %c0_4 = arith.constant 0 : index
    %c0_5 = arith.constant 0 : index
    %36 = vector.load %arg3[%c0_4, %c0_5] : memref<8x128xf32, #tpu.memory_space<vmem>>, vector<8x128xf32>
    tpu.vector_store %arg3[%c0_4, %c0_5], %35 {strides = array<i32>} : memref<8x128xf32, #tpu.memory_space<vmem>>, vector<8x128xf32>,
    return
  }
  func.func @transform_0(%arg0: i32, %arg1: memref<16xf32, #tpu.memory_space<smem>>) -> (i32, i32) {
    %c0_i32 = arith.constant 0 : i32
    %c0_i32_0 = arith.constant 0 : i32
    return %arg0, %c0_i32 : i32, i32
  }
  func.func @transform_1(%arg0: i32, %arg1: memref<16xf32, #tpu.memory_space<smem>>) -> (i32, i32) {
    %c0_i32 = arith.constant 0 : i32
    %c0_i32_0 = arith.constant 0 : i32
    return %arg0, %c0_i32 : i32, i32
  }
}

</mosaic_0001>

<bundles_post_ra>
// kernel: band_stop_spectral_filter.1
= control target key start
LH: loop header
LB: loop body
LE: loop exit
PB: predicated region body
PF: predicated region fallthrough
CT: control target
= control target key end

     0   :  { %s104_s0 = inlined_call_operand.vmem [shape: f32[16], index: 0, kind: input, shape index: {}]   ;;  %s105_s1 = inlined_call_operand.vmem [shape: f32[8,128], index: 1, kind: input, shape index: {}]   ;;  %s106_s2 = inlined_call_operand.vmem [shape: f32[8,128], index: 2, kind: output, shape index: {}]  }
   0x1   :  { %s7_s11 = sshll.u32 %s104_s0, 4  ;;  %s8_s11 = int_to_ptr.vmem [resolvable:$true] %s7_s11 }
   0x2   :  { %s65_s12 = scalar_lea.vmem %s8_s11, 16  ;;  %p70_p1 = scmp.lt.s32.totalorder %s8_s11, %s8_s11 }
   0x3   :  { %p66_p0 = scmp.ne.s32.totalorder %s8_s11, %s65_s12  ;;  %p71_p2 = scmp.lt.s32.totalorder %s65_s12, %s65_s12 }
   0x5   :  { %p72_p3 = por %p71_p2, %p70_p1 }
   0x7   :  { %p73_p4 = pnand %p72_p3, %p66_p0 }
   0x9   :  { %76 = shalt.err (!%p73_p4)  }
   0xa   :  { %s79_s13 = smov [#allocation3]  }
   0xb   :  { %10 = dma.vmem_to_smem %s8_s11, 16, %s79_s13, [#allocation2] }
   0xc   :  { %77 = dma.done.wait [#allocation2], 16 }
   0xd   :  { %78 = vsyncadd [#allocation2], 4294967280 }
   0xe   :  { %12 = sfence }
   0xf   :  { %s15_s14 = sld [smem:[#allocation3]]  ;;  %s60_s15 = sld [smem:[#allocation3 + $0x7]]  ;;  %v24_v0 = vld [vmem:[%s105_s1] sm:$0xff] }
  0x10   :  { %s61_s16 = sld [smem:[#allocation3 + $0x8]]  ;;  %s59_s0 = sld [smem:[#allocation3 + $0x6]] }
  0x11   :  { %s55_s19 = sld [smem:[#allocation3 + $0x2]]  ;;  %s54_s20 = sld [smem:[#allocation3 + $0x1]] }
  0x12   :  { %s58_s21 = sld [smem:[#allocation3 + $0x5]]  ;;  %s57_s22 = sld [smem:[#allocation3 + $0x4]] }
  0x13   :  { %s56_s23 = sld [smem:[#allocation3 + $0x3]] }
  0x15   :  { %v25_v1 = vstv %s15_s14  ;;  %v27_v3 = vstv %s60_s15 }
  0x16   :  { %v26_v2 = vmul.f32 %v25_v1, %v24_v0  ;;  %v29_v5 = vstv %s61_s16  ;;  %v35_v10 = vstv %s59_s0 }
  0x17   :  { %v41_v11 = vstv %s55_s19  ;;  %v39_v14 = vstv %s54_s20 }
  0x18   :  { %v28_v4 = vmul.f32 %v27_v3, %v26_v2  ;;  %v37_v13 = vstv %s58_s21  ;;  %vm42_vm0 = vcmp.gt.f32.partialorder %v26_v2, %v41_v11  ;;  %v43_v16 = vstv %s57_s22 }
  0x19   :  { %vm40_vm1 = vcmp.lt.f32.partialorder %v26_v2, %v39_v14  ;;  %v45_v18 = vstv %s56_s23 }
  0x1a   :  { %v30_v6 = vsub.f32 %v28_v4, %v29_v5 }
  0x1c   :  { %v31_v7 = vmul.f32 %v30_v6, %v30_v6 }
  0x1e   :  { %v32_v8 = vsub.f32 0.0, %v31_v7 }
  0x20   :  { %v33_v9 = vmul.f32 1.442695, %v32_v8 }
  0x22   :  { %63 = vpow2.f32 %v33_v9 }
  0x2c   :  { %v64_v12 = vpop.eup %63 }
  0x2d   :  { %v36_v15 = vmul.f32 %v64_v12, %v35_v10 }
  0x2f   :  { %v38_v17 = vadd.f32 %v37_v13, %v36_v15 }
  0x31   :  { %v44_v19 = vsel %vm42_vm0, %v43_v16, %v38_v17 }
  0x32   :  { %v46_v20 = vsel %vm40_vm1, %v45_v18, %v44_v19 }
  0x33   :  { %v47_v21 = vmax.f32 %v46_v20, 1e-06 }
  0x35   :  { %v48_v22 = vmin.f32 %v47_v21, 1.0 }
  0x37   :  { %49 = vst [vmem:[%s106_s2] sm:$0xff] %v48_v22 }

</bundles_post_ra>
